<compile_context>
chip_gen: v5e
topology: v5e:2x2
jax: 0.10.0
libtpu: 0.0.40
codegen_flags: <defaults>
</compile_context>

<pallas_src>
import math
import numpy as np
import jax
import jax.numpy as jnp
from jax.experimental import pallas as pl
from jax.experimental.pallas import tpu as pltpu

# ---- model configuration (ShallowConvNet with n_time_points = 50) ----
N = 4                                  # batch (#samples)
C = 8                                  # n_channels
T = 50                                 # n_time_points (50 branch of the module)
NCLS = 2                               # classifier output channels (fixed by module)
SCALING = T / 500.0
KT = math.ceil(25 * SCALING)           # 3   timeConv kernel width
POOL_K = math.ceil(75 * SCALING)       # 8   avg-pool window
POOL_S = math.ceil(15 * SCALING)       # 2   avg-pool stride
F = 40                                 # feature maps
W1 = T - KT + 1                        # 48  width after timeConv
PW = (W1 - POOL_K) // POOL_S + 1       # 21  width after pooling (== classifier kernel)
BN_EPS = 1e-5
LOG_EPS = 1e-12                        # TODO(synk): torch uses a plain log (no epsilon)
assert PW == 21 and NCLS == 2

# ---- derived layout constants ----
KC1 = KT * C + 1        # 25  im2col rows + constant-1 bias row
NW1 = N * W1            # 192 batched width after timeConv
NPW = N * PW            # 84  batched width after pooling
CLANES = NCLS * N * PW  # 168 class-stacked pooled lanes
ZW = NCLS * N           # 8   class-stacked logits
SEG_ROW0 = 48           # start row of seg2 in the bf16 slab (bf16 sublane-tile aligned)
assert SEG_ROW0 >= F and SEG_ROW0 % 16 == 0
CF_ROWS = NW1 + F + 1   # 233 rows of the f32 constant slab
CB_ROWS = SEG_ROW0 + CLANES  # 216 rows of the bf16 constant slab


def shallowconvnet_kernel(xcol_ref, cf_ref, cb_ref, out_ref):
    # fused timeConv + spatConv + BatchNorm (+ bias via the constant-1 row): one MXU matmul
    wf = cb_ref[0:F, 0:KC1]                                              # (40, 25) bf16
    y = jnp.dot(wf, xcol_ref[...], preferred_element_type=jnp.float32)   # (40, 192) f32
    y = y * y                                                            # square nonlinearity

    # AvgPool2d((1, 8), stride (1, 2)) for the whole batch: block-diagonal matmul, f32.
    pool = cf_ref[0:NW1, 0:NPW]                                          # (192, 84) f32
    pooled = jnp.dot(y, pool, preferred_element_type=jnp.float32)        # (40, 84) f32
    logp = jnp.log(pooled + LOG_EPS)

    # Dropout(p=0.5): inference mode == identity.

    # classifier Conv2d(40, 2, (1, 21)): both classes fused along the lane axis.
    wct = cf_ref[NW1:NW1 + F, :]                                         # (40, 168) f32
    prod = (jnp.concatenate([logp, logp], axis=1) * wct).astype(jnp.bfloat16)
    seg = cb_ref[SEG_ROW0:SEG_ROW0 + CLANES, 0:ZW]                       # (168, 8) bf16
    per_f = jnp.dot(prod, seg, preferred_element_type=jnp.float32)       # (40, 8) f32
    z = jnp.sum(per_f, axis=0, keepdims=True) \
        + cf_ref[NW1 + F:NW1 + F + 1, 0:ZW]                              # (1, 8): + bias

    # LogSoftmax over the class axis (NCLS == 2); single store of the (2, N) block.
    z0, z1 = z[:, 0:N], z[:, N:ZW]                                       # (1, N) each
    m = jnp.maximum(z0, z1)
    lse = m + jnp.log(jnp.exp(z0 - m) + jnp.exp(z1 - m))
    out_ref[...] = jnp.concatenate([z0, z1], axis=0) - lse               # (2, N)


@jax.jit
def shallowconvnet_forward(x, consts_f32, consts_bf16):
    # Layout plumbing (outside the kernel): im2col + constant-1 bias row, cast once to bf16.
    # xcol[k*C + c, n*W1 + w] = x[n, c, w + k]
    cols = jnp.concatenate([x[:, :, k:k + W1] for k in range(KT)], axis=1)     # (N, KT*C, W1)
    xcol = jnp.transpose(cols, (1, 0, 2)).reshape(KT * C, NW1)                 # (24, 192)
    xcol_aug = jnp.concatenate([xcol, jnp.ones((1, NW1), x.dtype)], axis=0)    # (25, 192)
    xcol_aug = xcol_aug.astype(jnp.bfloat16)

    vmem = pl.BlockSpec(memory_space=pltpu.MemorySpace.VMEM)
    out = pl.pallas_call(
        shallowconvnet_kernel,
        out_shape=jax.ShapeDtypeStruct((NCLS, N), jnp.float32),
        in_specs=[vmem, vmem, vmem],
        out_specs=vmem,
    )(xcol_aug, consts_f32, consts_bf16)
    return out.T                                                               # (N, NCLS)


def init_raw_params(key):
    """Raw torch-like parameters (weights, biases, BN stats)."""
    ks = jax.random.split(key, 9)
    w1 = jax.random.normal(ks[0], (F, KT), jnp.float32) * 0.2        # Conv2d(1,40,(1,3)).weight
    b1 = jax.random.normal(ks[1], (F,), jnp.float32) * 0.1           # Conv2d(1,40,(1,3)).bias
    w2 = jax.random.normal(ks[2], (F, F, C), jnp.float32) * 0.05     # Conv2d(40,40,(C,1)).weight
    gamma = 1.0 + 0.1 * jax.random.normal(ks[3], (F,), jnp.float32)  # BN weight
    beta = 0.1 * jax.random.normal(ks[4], (F,), jnp.float32)         # BN bias
    run_mean = 0.1 * jax.random.normal(ks[5], (F,), jnp.float32)
    run_var = jax.random.uniform(ks[6], (F,), jnp.float32, minval=0.5, maxval=1.5)
    wc = jax.random.normal(ks[7], (NCLS, F, PW), jnp.float32) * 0.05  # Conv2d(40,2,(1,21)).weight
    bc = jax.random.normal(ks[8], (NCLS,), jnp.float32) * 0.1         # Conv2d(40,2,(1,21)).bias
    return (w1, b1, w2, gamma, beta, run_mean, run_var, wc, bc)


def fold_params(raw):
    """Fold the convs/BN and pack all constants into two dtype-grouped, lane-dense slabs."""
    w1, b1, w2, gamma, beta, run_mean, run_var, wc, bc = [np.asarray(p) for p in raw]
    inv_std = 1.0 / np.sqrt(run_var + BN_EPS)
    bns = gamma * inv_std
    bnb = beta - run_mean * bns

    # wf[f, k*C + c] = bns[f] * sum_g w2[f, g, c] * w1[g, k]; bias column appended.
    tmp = np.einsum('fgc,gk->fkc', w2, w1)                             # (F, KT, C)
    wf = (bns[:, None, None] * tmp).reshape(F, KT * C)
    bf = bns * np.einsum('fgc,g->f', w2, b1) + bnb
    wf_aug = np.concatenate([wf, bf[:, None]], axis=1)                 # (40, 25)

    # block-diagonal average-pooling matrix over the batched width axis (1/8 exact)
    pool = np.zeros((NW1, NPW), np.float32)
    for n in range(N):
        for j in range(PW):
            r0 = n * W1 + j * POOL_S
            pool[r0:r0 + POOL_K, n * PW + j] = 1.0 / POOL_K

    # classifier weights: classes stacked on the lane axis, tiled over samples
    # wct2[f, k*N*PW + n*PW + j] = wc[k, f, j]
    wct2 = np.broadcast_to(
        np.transpose(wc, (1, 0, 2))[:, :, None, :], (F, NCLS, N, PW)
    ).reshape(F, CLANES).astype(np.float32)

    # per-(class, sample) segment-sum matrix (0/1 entries, exact in bf16)
    seg2 = np.zeros((CLANES, ZW), np.float32)
    for col in range(ZW):                       # col = k*N + n
        seg2[col * PW:(col + 1) * PW, col] = 1.0

    bc2 = np.repeat(bc, N).astype(np.float32)   # (8,) class bias tiled over samples

    # f32 slab: pool (rows 0:192), wct2 (rows 192:232), bc2 (row 232) -- rows tile-aligned
    cf = np.zeros((CF_ROWS, CLANES), np.float32)
    cf[0:NW1, 0:NPW] = pool
    cf[NW1:NW1 + F, :] = wct2
    cf[NW1 + F, 0:ZW] = bc2

    # bf16 slab: wf_aug (rows 0:40), seg2 (rows 48:216) -- rows bf16 tile-aligned
    cb = np.zeros((CB_ROWS, KC1), np.float32)
    cb[0:F, :] = wf_aug
    cb[SEG_ROW0:SEG_ROW0 + CLANES, 0:ZW] = seg2

    return jnp.asarray(cf, jnp.float32), jnp.asarray(cb).astype(jnp.bfloat16)


def reference_numpy(x, raw):
    """Pure numpy reference mirroring the torch forward (inference mode)."""
    w1, b1, w2, gamma, beta, run_mean, run_var, wc, bc = [np.asarray(p) for p in raw]
    x = np.asarray(x)
    n = x.shape[0]
    out1 = np.zeros((n, F, C, W1), np.float32)
    for k in range(KT):
        out1 += w1[None, :, k, None, None] * x[:, None, :, k:k + W1]
    out1 += b1[None, :, None, None]
    out2 = np.einsum('fgc,ngct->nft', w2, out1)                       # spatConv (no bias)
    bns = gamma / np.sqrt(run_var + BN_EPS)
    bnb = beta - run_mean * bns
    y = out2 * bns[None, :, None] + bnb[None, :, None]
    y = y * y
    pooled = np.zeros((n, F, PW), np.float32)
    for j in range(PW):
        pooled[:, :, j] = y[:, :, j * POOL_S:j * POOL_S + POOL_K].mean(axis=2)
    logp = np.log(pooled)
    z = np.einsum('kfj,nfj->nk', wc, logp) + bc[None, :]
    m = z.max(axis=1, keepdims=True)
    lse = m + np.log(np.exp(z - m).sum(axis=1, keepdims=True))
    return z - lse


if __name__ == "__main__":
    key = jax.random.PRNGKey(0)
    kx, kp = jax.random.split(key)
    x = jax.random.normal(kx, (N, C, T), jnp.float32)   # (#Samples, #Channels, #TimePoints)
    raw = init_raw_params(kp)
    consts_f32, consts_bf16 = fold_params(raw)

    out = shallowconvnet_forward(x, consts_f32, consts_bf16)
    out = jax.block_until_ready(out)

    assert out.shape == (N, NCLS), out.shape
    ref = reference_numpy(x, raw)
    err = np.abs(np.asarray(out) - ref).max()
    if not np.allclose(np.asarray(out), ref, rtol=5e-2, atol=5e-2):
        raise AssertionError(f"kernel/reference mismatch, max abs err = {err}")
    print("KERNEL_OK")
</pallas_src>

<mosaic_0001>
module attributes {stable_mosaic.version = 11 : i64} {
  func.func @shallowconvnet_kernel(%arg0: memref<25x192xbf16, #tpu.memory_space<vmem>>, %arg1: memref<233x168xf32, #tpu.memory_space<vmem>>, %arg2: memref<216x25xbf16, #tpu.memory_space<vmem>>, %arg3: memref<2x4xf32, #tpu.memory_space<vmem>>) attributes {dimension_semantics = [], scalar_prefetch = 0 : i64, scratch_operands = 0 : i64, tpu.core_type = #tpu.core_type<tc>} {
    %c0 = arith.constant 0 : index
    %c0_0 = arith.constant 0 : index
    %0 = vector.load %arg2[%c0, %c0_0] : memref<216x25xbf16, #tpu.memory_space<vmem>>, vector<40x25xbf16>
    %c0_1 = arith.constant 0 : index
    %c0_2 = arith.constant 0 : index
    %1 = vector.load %arg0[%c0_1, %c0_2] : memref<25x192xbf16, #tpu.memory_space<vmem>>, vector<25x192xbf16>
    %cst = arith.constant dense<0.000000e+00> : vector<40x192xf32>
    %2 = tpu.matmul %0, %1, %cst {dimension_numbers = #tpu.dot_dimension_numbers<[1], [0], [0], [1], [0, 0, 1, 1], [], []>} : vector<40x25xbf16>, vector<25x192xbf16>, vector<40x192xf32> -> vector<40x192xf32>
    %3 = arith.mulf %2, %2 : vector<40x192xf32>
    %c0_3 = arith.constant 0 : index
    %c0_4 = arith.constant 0 : index
    %4 = vector.load %arg1[%c0_3, %c0_4] : memref<233x168xf32, #tpu.memory_space<vmem>>, vector<192x84xf32>
    %cst_5 = arith.constant dense<0.000000e+00> : vector<40x84xf32>
    %5 = tpu.matmul %3, %4, %cst_5 {dimension_numbers = #tpu.dot_dimension_numbers<[1], [0], [0], [1], [0, 0, 1, 1], [], []>} : vector<40x192xf32>, vector<192x84xf32>, vector<40x84xf32> -> vector<40x84xf32>
    %cst_6 = arith.constant 9.99999996E-13 : f32
    %6 = vector.broadcast %cst_6 : f32 to vector<40x84xf32>
    %7 = arith.addf %5, %6 : vector<40x84xf32>
    %8 = math.log %7 : vector<40x84xf32>
    %c192 = arith.constant 192 : index
    %c0_7 = arith.constant 0 : index
    %9 = vector.load %arg1[%c192, %c0_7] : memref<233x168xf32, #tpu.memory_space<vmem>>, vector<40x168xf32>
    %10 = tpu.concatenate %8, %8 in 1 : vector<40x84xf32>, vector<40x84xf32> -> vector<40x168xf32>
    %11 = arith.mulf %10, %9 : vector<40x168xf32>
    %12 = arith.truncf %11 : vector<40x168xf32> to vector<40x168xbf16>
    %c48 = arith.constant 48 : index
    %c0_8 = arith.constant 0 : index
    %13 = vector.load %arg2[%c48, %c0_8] : memref<216x25xbf16, #tpu.memory_space<vmem>>, vector<168x8xbf16>
    %cst_9 = arith.constant dense<0.000000e+00> : vector<40x8xf32>
    %14 = tpu.matmul %12, %13, %cst_9 {dimension_numbers = #tpu.dot_dimension_numbers<[1], [0], [0], [1], [0, 0, 1, 1], [], []>} : vector<40x168xbf16>, vector<168x8xbf16>, vector<40x8xf32> -> vector<40x8xf32>
    %cst_10 = arith.constant dense<0.000000e+00> : vector<8xf32>
    %15 = vector.multi_reduction <add>, %14, %cst_10 [0] : vector<40x8xf32> to vector<8xf32>
    %16 = vector.shape_cast %15 : vector<8xf32> to vector<1x8xf32>
    %c232 = arith.constant 232 : index
    %c0_11 = arith.constant 0 : index
    %17 = vector.load %arg1[%c232, %c0_11] : memref<233x168xf32, #tpu.memory_space<vmem>>, vector<1x8xf32>
    %18 = arith.addf %16, %17 : vector<1x8xf32>
    %19 = vector.extract_strided_slice %18 {offsets = [0, 0], sizes = [1, 4], strides = [1, 1]} : vector<1x8xf32> to vector<1x4xf32>
    %20 = vector.extract_strided_slice %18 {offsets = [0, 4], sizes = [1, 4], strides = [1, 1]} : vector<1x8xf32> to vector<1x4xf32>
    %21 = arith.maximumf %19, %20 : vector<1x4xf32>
    %22 = arith.subf %19, %21 : vector<1x4xf32>
    %23 = math.exp %22 : vector<1x4xf32>
    %24 = arith.subf %20, %21 : vector<1x4xf32>
    %25 = math.exp %24 : vector<1x4xf32>
    %26 = arith.addf %23, %25 : vector<1x4xf32>
    %27 = math.log %26 : vector<1x4xf32>
    %28 = arith.addf %21, %27 : vector<1x4xf32>
    %29 = tpu.concatenate %19, %20 in 0 : vector<1x4xf32>, vector<1x4xf32> -> vector<2x4xf32>
    %30 = vector.broadcast %28 : vector<1x4xf32> to vector<2x4xf32>
    %31 = arith.subf %29, %30 : vector<2x4xf32>
    %c0_12 = arith.constant 0 : index
    %c0_13 = arith.constant 0 : index
    %32 = vector.load %arg3[%c0_12, %c0_13] : memref<2x4xf32, #tpu.memory_space<vmem>>, vector<2x4xf32>
    tpu.vector_store %arg3[%c0_12, %c0_13], %31 {strides = array<i32>} : memref<2x4xf32, #tpu.memory_space<vmem>>, vector<2x4xf32>,
    return
  }
}

</mosaic_0001>

<bundles_post_ra>
// kernel: shallowconvnet_forward.1
= control target key start
LH: loop header
LB: loop body
LE: loop exit
PB: predicated region body
PF: predicated region fallthrough
CT: control target
= control target key end

     0   :  { %vm66_vm0 = vcmask 1043456   ;;  %vm67_vm1 = vcmask 1044480   ;;  %v649_v5 = vmov 65535   ;;  %vm56_vm2 = vcmask 203776   ;;  %s874_s0 = inlined_call_operand.vmem [shape: bf16[25,192], index: 0, kind: input, shape index: {}]   ;;  %s875_s1 = inlined_call_operand.vmem [shape: f32[233,168], index: 1, kind: input, shape index: {}]   ;;  %s876_s2 = inlined_call_operand.vmem [shape: bf16[216,25], index: 2, kind: input, shape index: {}]   ;;  %s877_s3 = inlined_call_operand.hbm [shape: f32[2,4], index: 3, kind: output, shape index: {}]  }
   0x1   :  { %v522_v0 = vld [vmem:[%s874_s0 + $0x10] sm:$0xf]  ;;  %v587_v1 = vld [vmem:[%s874_s0 + $0x14] sm:$0x10]  ;;  %v586_v3 = vld [vmem:[%s874_s0 + $0x14] sm:$0xf] }
   0x2   :  { %v523_v2 = vor.u32 %v587_v1, %v522_v0  ;;  %v524_v4 = vld [vmem:[%s874_s0 + $0x18] sm:$0x10]  ;;  %v68_v6 = vsel %vm66_vm0, 4294967295, %v649_v5  ;;  %v514_v8 = vld [vmem:[%s874_s0] sm:$0xf]  ;;  %v147_v19 = vld [vmem:[%s875_s1 + $0xf0] sm:$0xff] }
   0x3   :  { %v527_v7 = vor.u32 %v586_v3, %v524_v4  ;;  %v585_v9 = vld [vmem:[%s874_s0 + $0x4] sm:$0xf0]  ;;  %v69_v10 = vsel %vm67_vm1, %v68_v6, 0  ;;  %v584_v11 = vld [vmem:[%s874_s0 + $0x4] sm:$0xf] }
   0x4   :  { %v516_v12 = vld [vmem:[%s874_s0 + $0x8] sm:$0xf0]  ;;  %v71_v13 = vand.u32 %v523_v2, %v69_v10  ;;  %v20_v15 = vld [vmem:[%s876_s2 + $0x10] sm:$0xf]  ;;  %v515_v16 = vor.u32 %v585_v9, %v514_v8  ;;  %v582_v20 = vld [vmem:[%s876_s2] sm:$0xff] }
   0x5   :  { %v74_v14 = vand.u32 %v527_v7, %v69_v10  ;;  %v519_v17 = vor.u32 %v584_v11, %v516_v12  ;;  %v34_v18 = vunpack.c.l.b16 %v20_v15 }
   0x6   :  { %82 = vmatpush.bf16.msra.mxu2 %v71_v13  ;;  %598 = vmatpush.bf16.msra.mxu3 %v71_v13 }
   0x7   :  { %105 = vmatpush.bf16.msra.mxu1 %v74_v14  ;;  %v37_v21 = vpack.c.b16 %v34_v18, %v34_v18 }
   0xa   :  { %83 = vmatpush.bf16.msra.mxu2 %v515_v16 }
   0xb   :  { %106 = vmatpush.bf16.msra.mxu1 %v519_v17 }
   0xc   :  { %8 = vsyncpa [#allocation3], 0  ;;  %599 = vmatpush.bf16.msra.mxu3 %v515_v16  ;;  %v146_v22 = vld [vmem:[%s875_s1 + $0xe0] sm:$0xff]  ;;  %v145_v23 = vld [vmem:[%s875_s1 + $0xd0] sm:$0xff]  ;;  %vm156_vm3 = vcmask 523264   ;;  %s650_s26 = smov 84  }
   0xd   :  { %528 = vmatmul.msk.bf16.vlgmr.msra.gmra.mxu2 %vm56_vm2, %v582_v20  ;;  %v155_v24 = vld [vmem:[%s875_s1 + $0x170] sm:$0xff]  ;;  %v144_v25 = vld [vmem:[%s875_s1 + $0xc0] sm:$0xff]  ;;  %v583_v35 = vld [vmem:[%s876_s2 + $0x8] sm:$0xff]  ;;  %vm276_vm4 = vcmask 687104   ;;  %vm382_vm5 = vcmask 326656   ;;  %vm441_vm6 = vcmask 64512  }
   0xe   :  { %172 = vmatpush.msrb.mxu2 %v147_v19  ;;  %531 = vmatmul.msk.bf16.vlgmr.msra.gmra.mxu1 %vm56_vm2, %v582_v20  ;;  %v154_v26 = vld [vmem:[%s875_s1 + $0x160] sm:$0xff]  ;;  %v143_v27 = vld [vmem:[%s875_s1 + $0xb0] sm:$0xff]  ;;  %v318_v15 = vld [vmem:[%s876_s2 + $0x68] sm:$0xf]  ;;  %s651_s14 = smov 124   ;;  %s652_s15 = smov 4  }
   0xf   :  { %530 = vmatmul.msk.bf16.vlgmr.msra.gmra.mxu3 %vm56_vm2, %v37_v21  ;;  %v153_v28 = vld [vmem:[%s875_s1 + $0x150] sm:$0xff]  ;;  %v142_v29 = vld [vmem:[%s875_s1 + $0xa0] sm:$0xff]  ;;  %v594_v19 = vld [vmem:[%s876_s2 + $0x48] sm:$0xff]  ;;  %vm482_vm7 = vcmask 1040384   ;;  %s495_s19 = sshll.u32 %s877_s3, 4  ;;  %vm486_vm8 = vcmask 25600   ;;  %s496_s19 = int_to_ptr.hbm [resolvable:$true] %s495_s19 }
  0x10   :  { %600 = vmatpush.bf16.msrb.mxu3 %v74_v14  ;;  %173 = vmatpush.msrb.mxu2 %v146_v22  ;;  %v152_v30 = vld [vmem:[%s875_s1 + $0x140] sm:$0xff]  ;;  %v141_v31 = vld [vmem:[%s875_s1 + $0x90] sm:$0xff] }
  0x11   :  { %v151_v32 = vld [vmem:[%s875_s1 + $0x130] sm:$0xff]  ;;  %v140_v33 = vld [vmem:[%s875_s1 + $0x80] sm:$0xff] }
  0x12   :  { %174 = vmatpush.msrb.mxu2 %v145_v23  ;;  %v150_v34 = vld [vmem:[%s875_s1 + $0x120] sm:$0xff]  ;;  %v139_v36 = vld [vmem:[%s875_s1 + $0x70] sm:$0xff] }
  0x13   :  { %v138_v37 = vld [vmem:[%s875_s1 + $0x60] sm:$0xff]  ;;  %v137_v38 = vld [vmem:[%s875_s1 + $0x50] sm:$0xff] }
  0x14   :  { %601 = vmatpush.bf16.msrb.mxu3 %v519_v17  ;;  %175 = vmatpush.msrb.mxu2 %v144_v25  ;;  %v136_v39 = vld [vmem:[%s875_s1 + $0x40] sm:$0xff]  ;;  %v149_v40 = vld [vmem:[%s875_s1 + $0x110] sm:$0xff]  ;;  %v360_v17 = vunpack.c.l.b16 %v318_v15 }
  0x15   :  { %v135_v41 = vld [vmem:[%s875_s1 + $0x30] sm:$0xff]  ;;  %v148_v42 = vld [vmem:[%s875_s1 + $0x100] sm:$0xff] }
  0x16   :  { %176 = vmatpush.msrb.mxu2 %v143_v27  ;;  %v134_v43 = vld [vmem:[%s875_s1 + $0x20] sm:$0xff]  ;;  %v133_v44 = vld [vmem:[%s875_s1 + $0x10] sm:$0xff] }
  0x17   :  { %v132_v45 = vld [vmem:[%s875_s1] sm:$0xff]  ;;  %v595_v16 = vld [vmem:[%s876_s2 + $0x50] sm:$0xff] }
  0x18   :  { %212 = vmatpush.msra.mxu3 %v155_v24  ;;  %177 = vmatpush.msrb.mxu2 %v142_v29  ;;  %v597_v27 = vld [vmem:[%s876_s2 + $0x60] sm:$0xff] }
  0x19   :  { %395 = vmatpush.bf16.msra.mxu0 %v595_v16  ;;  %v254_v15 = vld [vmem:[%s875_s1 + $0x1c0] sm:$0xff] }
  0x1a   :  { %213 = vmatpush.msra.mxu3 %v154_v26  ;;  %178 = vmatpush.msrb.mxu2 %v141_v31  ;;  %v593_v26 = vld [vmem:[%s876_s2 + $0x40] sm:$0xff] }
  0x1c   :  { %214 = vmatpush.msra.mxu3 %v153_v28  ;;  %179 = vmatpush.msrb.mxu2 %v140_v33 }
  0x1d   :  { %529 = vmatmul.msk.bf16.gmra.mxu2 %vm56_vm2, %v583_v35  ;;  %396 = vmatpush.bf16.msra.mxu0 %v594_v19 }
  0x1e   :  { %215 = vmatpush.msra.mxu3 %v152_v30  ;;  %180 = vmatpush.msrb.mxu2 %v139_v36  ;;  %v592_v30 = vld [vmem:[%s876_s2 + $0x38] sm:$0xff] }
  0x1f   :  { %532 = vmatmul.msk.bf16.gmra.mxu1 %vm56_vm2, %v583_v35  ;;  %533 = vmatmul.msk.bf16.vlgmr.msrb.gmra.mxu3 %vm56_vm2, %v37_v21  ;;  %v371_v21 = vpack.c.b16 %v360_v17, %v360_v17  ;;  %v591_v35 = vld [vmem:[%s876_s2 + $0x30] sm:$0xff] }
  0x20   :  { %216 = vmatpush.msra.mxu3 %v151_v32  ;;  %181 = vmatpush.msrb.mxu2 %v138_v37 }
  0x21   :  { %v393_v24 = vsel %vm66_vm0, %v371_v21, 0  ;;  %397 = vmatpush.bf16.msra.mxu0 %v593_v26 }
  0x22   :  { %217 = vmatpush.msra.mxu3 %v150_v34  ;;  %182 = vmatpush.msrb.mxu2 %v137_v38 }
  0x23   :  { %423 = vmatpush.bf16.msrb.mxu1 %v393_v24 }
  0x24   :  { %183 = vmatpush.msrb.mxu2 %v136_v39  ;;  %218 = vmatpush.msra.mxu3 %v149_v40 }
  0x25   :  { %398 = vmatpush.bf16.msra.mxu0 %v592_v30 }
  0x26   :  { %184 = vmatpush.msrb.mxu2 %v135_v41  ;;  %219 = vmatpush.msra.mxu3 %v148_v42 }
  0x27   :  { %424 = vmatpush.bf16.msrb.mxu1 %v597_v27 }
  0x28   :  { %185 = vmatpush.msrb.mxu2 %v134_v43 }
  0x29   :  { %399 = vmatpush.bf16.msra.mxu0 %v591_v35 }
  0x2a   :  { %186 = vmatpush.msrb.mxu2 %v133_v44  ;;  %v590_v44 = vld [vmem:[%s876_s2 + $0x28] sm:$0xff] }
  0x2c   :  { %187 = vmatpush.msrb.mxu2 %v132_v45  ;;  %v596_v45 = vld [vmem:[%s876_s2 + $0x58] sm:$0xff] }
  0x2d   :  { %400 = vmatpush.bf16.msra.mxu0 %v590_v44  ;;  %425 = vmatpush.bf16.msrb.mxu1 %v596_v45 }
  0x8b   :  { %v108_v46 = vpop.f32.mrf.mxu1 }
  0x8c   :  { %v123_v47 = vmul.f32 %v108_v46, %v108_v46  ;;  %v589_v46 = vld [vmem:[%s876_s2 + $0x20] sm:$0xff] }
  0x8d   :  { %401 = vmatpush.bf16.msra.mxu0 %v589_v46 }
  0x8e   :  { %534 = vmatmul.msk.f32.vlgmr.msra.gmra.mxu3 %vm156_vm3, %v123_v47  ;;  %v588_v47 = vld [vmem:[%s876_s2 + $0x18] sm:$0xff] }
  0x90   :  { %v85_v48 = vpop.f32.mrf.mxu2 }
  0x91   :  { %v122_v49 = vmul.f32 %v85_v48, %v85_v48  ;;  %402 = vmatpush.bf16.msra.mxu0 %v588_v47 }
  0x92   :  { %v95_v50 = vpop.f32.mrf.mxu3 }
  0x93   :  { %v110_v51 = vpop.f32.mrf.mxu1  ;;  %188 = vmatmul.f32.vlgmr.msrb.gmra.mxu2 %v122_v49  ;;  %v130_v3 = vmul.f32 %v95_v50, %v95_v50  ;;  %v247_v49 = vld [vmem:[%s875_s1 + $0x188] sm:$0xff]  ;;  %v249_v50 = vld [vmem:[%s875_s1 + $0x198] sm:$0xff] }
  0x94   :  { %v125_v52 = vmul.f32 %v110_v51, %v110_v51  ;;  %v246_v51 = vld [vmem:[%s875_s1 + $0x180] sm:$0xff] }
  0x96   :  { %535 = vmatmul.msk.f32.gmra.mxu3 %vm156_vm3, %v125_v52 }
  0x98   :  { %v87_v53 = vpop.f32.mrf.mxu2 }
  0x99   :  { %v124_v54 = vmul.f32 %v87_v53, %v87_v53  ;;  %v248_v53 = vld [vmem:[%s875_s1 + $0x190] sm:$0xff] }
  0x9a   :  { %v97_v55 = vpop.f32.mrf.mxu3 }
  0x9b   :  { %191 = vmatmul.f32.gmra.mxu2 %v124_v54 }
  0x9c   :  { %v113_v56 = vpop.f32.mrf.mxu1 }
  0x9d   :  { %v127_v57 = vmul.f32 %v113_v56, %v113_v56 }
  0x9f   :  { %536 = vmatmul.msk.f32.gmra.mxu3 %vm156_vm3, %v127_v57 }
  0xa0   :  { %v90_v58 = vpop.f32.mrf.mxu2 }
  0xa1   :  { %v126_v59 = vmul.f32 %v90_v58, %v90_v58 }
  0xa2   :  { %v118_v60 = vpop.f32.mrf.mxu3 }
  0xa3   :  { %194 = vmatmul.f32.gmra.mxu2 %v126_v59  ;;  %v131_v1 = vmul.f32 %v118_v60, %v118_v60 }
  0xa4   :  { %v115_v61 = vpop.f32.mrf.mxu1 }
  0xa5   :  { %v129_v62 = vmul.f32 %v115_v61, %v115_v61 }
  0xa7   :  { %537 = vmatmul.msk.f32.gmra.mxu3 %vm156_vm3, %v129_v62 }
  0xa8   :  { %v92_v63 = vpop.f32.mrf.mxu2 }
  0xa9   :  { %v128_v0 = vmul.f32 %v92_v63, %v92_v63  ;;  %v251_v63 = vld [vmem:[%s875_s1 + $0x1a8] sm:$0xff] }
  0xaa   :  { %v120_v2 = vpop.f32.mrf.mxu3 }
  0xab   :  { %197 = vmatmul.f32.gmra.mxu2 %v128_v0  ;;  %v253_v0 = vld [vmem:[%s875_s1 + $0x1b8] sm:$0xff] }
  0xaf   :  { %538 = vmatmul.msk.f32.gmra.mxu3 %vm156_vm3, %v131_v1  ;;  %v250_v1 = vld [vmem:[%s875_s1 + $0x1a0] sm:$0xff] }
  0xb3   :  { %200 = vmatmul.f32.gmra.mxu2 %v130_v3  ;;  %v252_v3 = vld [vmem:[%s875_s1 + $0x1b0] sm:$0xff] }
 0x111   :  { %v221_v4 = vpop.f32.mrf.mxu3 }
 0x116   :  { %v189_v5 = vpop.f32.mrf.mxu2 }
 0x117   :  { %v190_v6 = vadd.f32 1e-12, %v189_v5 }
 0x119   :  { %v222_v7 = vadd.f32 %v221_v4, %v190_v6  ;;  %v224_v8 = vpop.f32.mrf.mxu3 }
 0x11b   :  { %607 = vlog2.f32 %v222_v7 }
 0x11e   :  { %v192_v9 = vpop.f32.mrf.mxu2 }
 0x11f   :  { %v193_v10 = vadd.f32 1e-12, %v192_v9 }
 0x121   :  { %v608_v11 = vpop.eup %607  ;;  %v225_v12 = vadd.f32 %v224_v8, %v193_v10 }
 0x122   :  { %v237_v13 = vmul.f32 0.6931472, %v608_v11  ;;  %v227_v14 = vpop.f32.mrf.mxu3 }
 0x123   :  { %609 = vlog2.f32 %v225_v12 }
 0x124   :  { %261 = vrot.lane.b32.xlu0 %v237_v13, %s650_s26 }
 0x126   :  { %v195_v18 = vpop.f32.mrf.mxu2 }
 0x127   :  { %v196_v20 = vadd.f32 1e-12, %v195_v18 }
 0x129   :  { %v610_v22 = vpop.eup %609  ;;  %v228_v23 = vadd.f32 %v227_v14, %v196_v20 }
 0x12a   :  { %v239_v25 = vmul.f32 0.6931472, %v610_v22  ;;  %v230_v28 = vpop.f32.mrf.mxu3 }
 0x12b   :  { %611 = vlog2.f32 %v228_v23 }
 0x12c   :  { %263 = vrot.lane.b32.xlu0 %v239_v25, %s650_s26 }
 0x12e   :  { %v198_v29 = vpop.f32.mrf.mxu2 }
 0x12f   :  { %v199_v31 = vadd.f32 1e-12, %v198_v29 }
 0x131   :  { %v612_v32 = vpop.eup %611  ;;  %v231_v33 = vadd.f32 %v230_v28, %v199_v31 }
 0x132   :  { %v241_v34 = vmul.f32 0.6931472, %v612_v32  ;;  %v233_v37 = vpop.f32.mrf.mxu3 }
 0x133   :  { %613 = vlog2.f32 %v231_v33 }
 0x134   :  { %265 = vrot.lane.b32.xlu1 %v241_v34, %s650_s26 }
 0x136   :  { %v201_v36 = vpop.f32.mrf.mxu2 }
 0x137   :  { %v202_v38 = vadd.f32 1e-12, %v201_v36 }
 0x139   :  { %v614_v39 = vpop.eup %613  ;;  %v234_v40 = vadd.f32 %v233_v37, %v202_v38 }
 0x13a   :  { %v243_v41 = vmul.f32 0.6931472, %v614_v39 }
 0x13b   :  { %615 = vlog2.f32 %v234_v40 }
 0x13c   :  { %267 = vrot.lane.b32.xlu1 %v243_v41, %s650_s26 }
 0x141   :  { %v616_v42 = vpop.eup %615 }
 0x142   :  { %v245_v43 = vmul.f32 0.6931472, %v616_v42 }
 0x144   :  { %269 = vrot.lane.b32.xlu2 %v245_v43, %s650_s26 }
 0x196   :  { %v262_v48 = vpop.permute.xlu0 %261 }
 0x197   :  { %v277_v52 = vsel %vm276_vm4, %v237_v13, %v262_v48  ;;  %v283_v55 = vmul.f32 %v262_v48, %v247_v49  ;;  %v255_v13 = vld [vmem:[%s875_s1 + $0x1c8] sm:$0xff] }
 0x198   :  { %v282_v58 = vmul.f32 %v277_v52, %v246_v51  ;;  %v457_v51 = vld [vmem:[%s875_s1 + $0x1d0] ss:$0 sm:$0xff]  ;;  %s653_s1 = smov [#allocation2]  }
 0x199   :  { %s493_s16 = sshll.u32 %s653_s1, 4  ;;  %s494_s16 = int_to_ptr.vmem [resolvable:$true] %s493_s16 }
 0x19e   :  { %v264_v54 = vpop.permute.xlu0 %263  ;;  %v270_v12 = vpop.permute.xlu2 %269 }
 0x19f   :  { %v278_v56 = vsel %vm276_vm4, %v239_v25, %v264_v54  ;;  %v285_v57 = vmul.f32 %v264_v54, %v249_v50  ;;  %v281_v14 = vsel %vm276_vm4, %v245_v43, %v270_v12  ;;  %v291_v16 = vmul.f32 %v270_v12, %v255_v13 }
 0x1a0   :  { %v284_v59 = vmul.f32 %v278_v56, %v248_v53  ;;  %v290_v17 = vmul.f32 %v281_v14, %v254_v15 }
 0x1a1   :  { %v293_v60 = vpack.c.bf16 %v285_v57, %v283_v55  ;;  %v297_v18 = vpack.c.bf16 %v291_v16, %v291_v16 }
 0x1a2   :  { %v292_v61 = vpack.c.bf16 %v284_v59, %v282_v58  ;;  %v296_v19 = vpack.c.bf16 %v290_v17, %v290_v17 }
 0x1a3   :  { %579 = vmatmul.msk.bf16.vlgmr.msrb.gmra.mxu1 %vm382_vm5, %v293_v60 }
 0x1a4   :  { %403 = vmatmul.bf16.vlgmr.msra.gmra.mxu0 %v292_v61 }
 0x1a6   :  { %v266_v62 = vpop.permute.xlu1 %265 }
 0x1a7   :  { %v279_v2 = vsel %vm276_vm4, %v241_v34, %v266_v62  ;;  %v287_v5 = vmul.f32 %v266_v62, %v251_v63 }
 0x1a8   :  { %v286_v8 = vmul.f32 %v279_v2, %v250_v1 }
 0x1ae   :  { %v268_v4 = vpop.permute.xlu1 %267 }
 0x1af   :  { %v280_v6 = vsel %vm276_vm4, %v243_v41, %v268_v4  ;;  %v289_v7 = vmul.f32 %v268_v4, %v253_v0 }
 0x1b0   :  { %v288_v9 = vmul.f32 %v280_v6, %v252_v3 }
 0x1b1   :  { %v295_v10 = vpack.c.bf16 %v289_v7, %v287_v5 }
 0x1b2   :  { %v294_v11 = vpack.c.bf16 %v288_v9, %v286_v8 }
 0x1b3   :  { %580 = vmatmul.msk.bf16.gmra.mxu1 %vm382_vm5, %v295_v10 }
 0x1b4   :  { %408 = vmatmul.bf16.gmra.mxu0 %v294_v11 }
 0x1c3   :  { %581 = vmatmul.msk.bf16.gmra.mxu1 %vm382_vm5, %v297_v18 }
 0x1c4   :  { %413 = vmatmul.bf16.gmra.mxu0 %v296_v19 }
 0x220   :  { %v427_v20 = vpop.f32.mrf.mxu1 }
 0x221   :  { %v404_v21 = vpop.f32.mrf.mxu0 }
 0x222   :  { %v428_v29 = vadd.f32 %v427_v20, %v404_v21 }
 0x224   :  { %v442_v33 = vsel %vm441_vm6, %v428_v29, 0.0 }
 0x228   :  { %v429_v22 = vpop.f32.mrf.mxu1 }
 0x229   :  { %v406_v23 = vpop.f32.mrf.mxu0 }
 0x22a   :  { %v430_v26 = vadd.f32 %v429_v22, %v406_v23 }
 0x22c   :  { %v443_v31 = vsel %vm441_vm6, %v430_v26, 0.0 }
 0x22d   :  { %v444_v35 = vadd.f32 %v443_v31, %v442_v33 }
 0x230   :  { %v432_v24 = vpop.f32.mrf.mxu1 }
 0x231   :  { %v409_v25 = vpop.f32.mrf.mxu0 }
 0x232   :  { %v433_v30 = vadd.f32 %v432_v24, %v409_v25 }
 0x234   :  { %v445_v34 = vsel %vm441_vm6, %v433_v30, 0.0 }
 0x235   :  { %v446_v38 = vadd.f32 %v445_v34, %v444_v35 }
 0x238   :  { %v434_v27 = vpop.f32.mrf.mxu1 }
 0x239   :  { %v411_v28 = vpop.f32.mrf.mxu0 }
 0x23a   :  { %v435_v32 = vadd.f32 %v434_v27, %v411_v28 }
 0x23c   :  { %v447_v36 = vsel %vm441_vm6, %v435_v32, 0.0 }
 0x23d   :  { %v448_v41 = vadd.f32 %v447_v36, %v446_v38 }
 0x240   :  { %v437_v37 = vpop.f32.mrf.mxu1 }
 0x241   :  { %v414_v39 = vpop.f32.mrf.mxu0 }
 0x242   :  { %v438_v40 = vadd.f32 %v437_v37, %v414_v39 }
 0x244   :  { %v449_v42 = vsel %vm441_vm6, %v438_v40, 0.0 }
 0x245   :  { %v450_v43 = vadd.f32 %v449_v42, %v448_v41 }
 0x247   :  { %v451_v44 = vrot.slane %v450_v43, 4 }
 0x248   :  { %v439_v45 = vpop.f32.mrf.mxu1 }
 0x249   :  { %v452_v46 = vadd.f32 %v451_v44, %v450_v43  ;;  %v416_v47 = vpop.f32.mrf.mxu0 }
 0x24b   :  { %v453_v48 = vrot.slane %v452_v46, 2 }
 0x24d   :  { %v454_v49 = vadd.f32 %v453_v48, %v452_v46 }
 0x24f   :  { %v455_v50 = vrot.slane %v454_v49, 1 }
 0x251   :  { %v456_v52 = vadd.f32 %v455_v50, %v454_v49 }
 0x253   :  { %v458_v53 = vadd.f32 %v457_v51, %v456_v52 }
 0x255   :  { %460 = vrot.lane.b32.xlu2 %v458_v53, %s651_s14 }
 0x2af   :  { %v461_v54 = vpop.permute.xlu2 %460 }
 0x2b0   :  { %v463_v55 = vmax.f32 %v458_v53, %v461_v54  ;;  %v483_v5 = vsel %vm482_vm7, %v458_v53, %v461_v54 }
 0x2b2   :  { %468 = vrot.lane.b32.xlu0 %v463_v55, %s652_s15  ;;  %v464_v60 = vsub.f32 %v458_v53, %v463_v55 }
 0x2b4   :  { %v465_v61 = vmul.f32 1.442695, %v464_v60 }
 0x324   :  { %v469_v56 = vpop.permute.xlu0 %468 }
 0x325   :  { %v471_v57 = vsub.f32 %v458_v53, %v469_v56 }
 0x327   :  { %v472_v58 = vmul.f32 1.442695, %v471_v57 }
 0x329   :  { %617 = vpow2.f32 %v472_v58 }
 0x32a   :  { %619 = vpow2.f32 %v465_v61 }
 0x32f   :  { %v618_v59 = vpop.eup %617 }
 0x330   :  { %475 = vrot.lane.b32.xlu1 %v618_v59, %s651_s14  ;;  %v620_v62 = vpop.eup %619 }
 0x3a2   :  { %v476_v63 = vpop.permute.xlu1 %475 }
 0x3a3   :  { %v478_v0 = vadd.f32 %v620_v62, %v476_v63 }
 0x3a5   :  { %621 = vlog2.f32 %v478_v0 }
 0x3ab   :  { %v622_v1 = vpop.eup %621 }
 0x3ac   :  { %v480_v2 = vmul.f32 0.6931472, %v622_v1 }
 0x3ae   :  { %v481_v3 = vadd.f32 %v480_v2, %v463_v55 }
 0x3b0   :  { %v484_v4 = vperm.slane %v481_v3, 0 }
 0x3b2   :  { %v485_v6 = vsub.f32 %v483_v5, %v484_v4 }
 0x3b4   :  { %487 = vst.msk [vmem:[#allocation2] sm:$0x3] %vm486_vm8, %v485_v6 }
 0x3b5   :  { %498 = dma.vmem_to_hbm [thread:$0]  %s494_s16, 32, %s496_s19, [#allocation3]  }
 0x3b6   :  { %647 = dma.done.wait [#allocation3], 32  }
 0x3b7   :  { %648 = vsyncadd [#allocation3], 4294967264 }
 0x3b8   :  { %503 = vsyncpa [#allocation3], 1 }

</bundles_post_ra>
